<compile_context>
chip_gen: v7x
topology: tpu7x:2x2x1
jax: 0.10.0
libtpu: 0.0.40
codegen_flags: <defaults>
</compile_context>

<pallas_src>
import functools

import numpy as np
import jax
import jax.numpy as jnp
from jax.experimental import pallas as pl
from jax.experimental.pallas import tpu as pltpu

PATCH = 8
EMBED_DIM = 64
HIDDEN_DIM = 128
HEAD_PAD = 128                      # lane-dense head output (pp=64 padded to 128)
VMEM_LIMIT = 48 * 1024 * 1024       # fits v7x's 64 MiB physical VMEM with headroom


def _round_up(x, m):
    return ((x + m - 1) // m) * m


# --------------------------------------------------------------------------
# Fused depth-model kernel (patch-MLP stand-in for DPTDepthModel).
# TODO(synk): DPTDepthModel (ViT-L/16 backbone + refinement decoder) is not
# available in-script; a small deterministic patch-MLP depth model with the
# same I/O contract ((B,3,H,W) -> (B,H,W), non-negative) is used instead.
# --------------------------------------------------------------------------
def _depth_mlp_kernel(x_ref, we_ref, be_ref, w1_ref, b1_ref,
                      w2_ref, b2_ref, wh_ref, bh_ref, o_ref):
    # All tokens of the whole batch as one M block; weights resident in VMEM.
    x = x_ref[...]                                                  # (B*T, Cpp) bf16
    t = jnp.dot(x, we_ref[...], preferred_element_type=jnp.float32) + be_ref[...]
    tok = jax.nn.gelu(t, approximate=True)                          # f32 elementwise
    h = jax.nn.gelu(
        jnp.dot(tok.astype(jnp.bfloat16), w1_ref[...],
                preferred_element_type=jnp.float32) + b1_ref[...],
        approximate=True)
    tok = tok + jnp.dot(h.astype(jnp.bfloat16), w2_ref[...],
                        preferred_element_type=jnp.float32) + b2_ref[...]
    d = jnp.dot(tok.astype(jnp.bfloat16), wh_ref[...],
                preferred_element_type=jnp.float32) + bh_ref[...]   # (B*T, 128)
    o_ref[...] = jnp.maximum(d, 0.0)                                # non_negative=True


def init_depth_model_params(key, in_ch=3, patch=PATCH,
                            dim=EMBED_DIM, hidden=HIDDEN_DIM):
    ks = jax.random.split(key, 4)
    return {
        "w_embed": 0.02 * jax.random.normal(ks[0], (in_ch * patch * patch, dim), jnp.float32),
        "b_embed": jnp.zeros((1, dim), jnp.float32),
        "w1": 0.02 * jax.random.normal(ks[1], (dim, hidden), jnp.float32),
        "b1": jnp.zeros((1, hidden), jnp.float32),
        "w2": 0.02 * jax.random.normal(ks[2], (hidden, dim), jnp.float32),
        "b2": jnp.zeros((1, dim), jnp.float32),
        "w_head": 0.02 * jax.random.normal(ks[3], (dim, patch * patch), jnp.float32),
        "b_head": jnp.zeros((1, patch * patch), jnp.float32),
    }


def depth_model_forward(params, sample, patch=PATCH):
    """sample: (B, C, H, W) NCHW -> depth (B, H, W), non-negative."""
    B, C, H, W = sample.shape
    nh, nw = H // patch, W // patch
    T = nh * nw
    cpp = C * patch * patch

    # Patchify (cheap XLA glue at these sizes).
    # TODO(synk): at real (384x384) inputs fold the patchify into the kernel
    # (memory_space=pl.ANY + in-kernel DMA) to skip this un-pipelined 6-D
    # transpose and one HBM round-trip of the input.
    x = sample.reshape(B, C, nh, patch, nw, patch)
    x = x.transpose(0, 2, 4, 1, 3, 5).reshape(B * T, cpp).astype(jnp.bfloat16)

    we = params["w_embed"].astype(jnp.bfloat16)
    w1 = params["w1"].astype(jnp.bfloat16)
    w2 = params["w2"].astype(jnp.bfloat16)
    pp = params["w_head"].shape[1]
    # Lane-dense head: pad head weights/bias to 128 output lanes so the kernel
    # stores are unmasked; slice back to pp in the wrapper.
    wh = jnp.zeros((params["w_head"].shape[0], HEAD_PAD), jnp.bfloat16)
    wh = wh.at[:, :pp].set(params["w_head"].astype(jnp.bfloat16))
    bh = jnp.zeros((1, HEAD_PAD), jnp.float32).at[:, :pp].set(params["b_head"])
    be, b1, b2 = params["b_embed"], params["b1"], params["b2"]

    # Batch folded into the matmul M dimension (single-TC friendly on v5e/v6e).
    # TODO(synk): at real ViT token counts, tile M at 256 (128 on v5e) with a
    # grid, and keep a (B,) "parallel" axis for v7x's 2 TensorCores.
    d = pl.pallas_call(
        _depth_mlp_kernel,
        out_shape=jax.ShapeDtypeStruct((B * T, HEAD_PAD), jnp.float32),
    )(x, we, be, w1, b1, w2, b2, wh, bh)

    # TODO(synk): depatchify stays in XLA; fusing it (and the resize) into the
    # depth kernel needs an in-kernel (nh,nw,p,p)->(nh,p,nw,p) relayout.
    d = d[:, :pp].reshape(B, nh, nw, patch, patch)
    d = d.transpose(0, 1, 3, 2, 4).reshape(B, H, W)
    return d


# --------------------------------------------------------------------------
# Fused bicubic resize (PyTorch semantics: a=-0.75, align_corners=False)
# + scale_factor + Laplacian curvature operator, ONE kernel per image:
#   sd  = (scale*R) @ d @ C^T              (bf16 MXU, f32 accumulation)
#   lap = Dr @ sd + sd @ Dc^T              (f32; edge-replicated Laplacian)
# --------------------------------------------------------------------------
def _cubic_weight(t, a=-0.75):
    t = abs(float(t))
    if t <= 1.0:
        return (a + 2.0) * t ** 3 - (a + 3.0) * t ** 2 + 1.0
    elif t < 2.0:
        return a * t ** 3 - 5.0 * a * t ** 2 + 8.0 * a * t - 4.0 * a
    return 0.0


def _bicubic_matrix(n_out, n_in):
    W = np.zeros((n_out, n_in), np.float32)
    scale = n_in / n_out
    for i in range(n_out):
        src = (i + 0.5) * scale - 0.5
        i0 = int(np.floor(src))
        t = src - i0
        for k in range(-1, 3):
            w = _cubic_weight(k - t)
            idx = min(max(i0 + k, 0), n_in - 1)   # border replication
            W[i, idx] += w
    return W


def _laplacian_matrix(n):
    """lap(v) = D @ v with edge replication: v[i-1]+v[i+1]-2*v[i], clamped."""
    D = np.zeros((n, n), np.float32)
    for i in range(n):
        D[i, max(i - 1, 0)] += 1.0
        D[i, min(i + 1, n - 1)] += 1.0
        D[i, i] -= 2.0
    return D


def _resize_lap_kernel(p_ref, rs_ref, ct_ref, dr_ref, dct_ref, o_ref):
    d = p_ref[0]                                                     # (Hd, Wd) bf16
    t = jnp.dot(rs_ref[...], d, preferred_element_type=jnp.float32)  # (H, Wd)
    sd = jnp.dot(t.astype(jnp.bfloat16), ct_ref[...],
                 preferred_element_type=jnp.float32)                 # (H, W) = scale*resized
    lap = (jnp.dot(dr_ref[...], sd, preferred_element_type=jnp.float32)
           + jnp.dot(sd, dct_ref[...], preferred_element_type=jnp.float32))
    o_ref[0] = lap


def resize_scale_laplacian(pred, out_h, out_w, scale):
    """pred: (B, Hd, Wd) -> (B, out_h, out_w) Laplacian of (scale * bicubic-resize)."""
    B, h_in, w_in = pred.shape
    Rs = jnp.asarray(scale * _bicubic_matrix(out_h, h_in)).astype(jnp.bfloat16)
    CT = jnp.asarray(_bicubic_matrix(out_w, w_in).T).astype(jnp.bfloat16)
    Dr = jnp.asarray(_laplacian_matrix(out_h))          # (H, H) f32
    DcT = jnp.asarray(_laplacian_matrix(out_w).T)       # (W, W) f32
    return pl.pallas_call(
        _resize_lap_kernel,
        out_shape=jax.ShapeDtypeStruct((B, out_h, out_w), jnp.float32),
        grid_spec=pltpu.PrefetchScalarGridSpec(
            num_scalar_prefetch=0,
            grid=(B,),
            in_specs=[pl.BlockSpec((1, h_in, w_in), lambda b: (b, 0, 0)),
                      pl.BlockSpec((out_h, h_in), lambda b: (0, 0)),
                      pl.BlockSpec((w_in, out_w), lambda b: (0, 0)),
                      pl.BlockSpec((out_h, out_h), lambda b: (0, 0)),
                      pl.BlockSpec((out_w, out_w), lambda b: (0, 0))],
            out_specs=pl.BlockSpec((1, out_h, out_w), lambda b: (b, 0, 0)),
        ),
        compiler_params=pltpu.CompilerParams(dimension_semantics=("parallel",)),
    )(pred.astype(jnp.bfloat16), Rs, CT, Dr, DcT)


# --------------------------------------------------------------------------
# GetCurvature.get_curv_descs stand-in: patchified Laplacian descriptors.
# (The Laplacian itself is computed inside the resize kernel above.)
# TODO(synk): GetCurvature source not provided; synthetic Laplacian-curvature
# 8x8 patch descriptors with matching shapes are used.
# --------------------------------------------------------------------------
def patch_descriptors(lap, patch=PATCH):
    """lap: (H, W) curvature map -> descriptors (L, C), L=(H/p)*(W/p), C=p*p."""
    # TODO(synk): this patchify transpose is plain XLA glue; fusing it into the
    # resize/Laplacian kernel needs an in-kernel relayout.
    H, W = lap.shape
    nh, nw = H // patch, W // patch
    d = lap.reshape(nh, patch, nw, patch).transpose(0, 2, 1, 3)
    return d.reshape(nh * nw, patch * patch)


# --------------------------------------------------------------------------
# Tiled cdist(p=2) + min/max normalization, two passes.
#   pass 1: per-tile min/max of squared distances (tiny stat outputs)
#   pass 2: recompute each tile, normalize with (cmin, 1/range) from SMEM
# --------------------------------------------------------------------------
def _tile_d2(a, bt):
    """Squared pairwise distances for one (TL, C) x (C, TS) tile, f32."""
    g = jnp.dot(a, bt, preferred_element_type=jnp.float32)           # (TL, TS)
    na = jnp.sum(a * a, axis=1, keepdims=True)                       # (TL, 1)
    nb = jnp.sum(bt * bt, axis=0, keepdims=True)                     # (1, TS)
    return jnp.maximum(na + nb - 2.0 * g, 0.0)


def _cdist_stats_kernel(a_ref, bt_ref, min_ref, max_ref, *, tl, ts, n_rows, n_cols):
    d2 = _tile_d2(a_ref[...], bt_ref[...])
    row = pl.program_id(0) * tl + jax.lax.broadcasted_iota(jnp.int32, d2.shape, 0)
    col = pl.program_id(1) * ts + jax.lax.broadcasted_iota(jnp.int32, d2.shape, 1)
    valid = (row < n_rows) & (col < n_cols)
    big = jnp.finfo(jnp.float32).max
    dmin = jnp.min(jnp.min(jnp.where(valid, d2, big),
                           axis=1, keepdims=True), axis=0, keepdims=True)
    dmax = jnp.max(jnp.max(jnp.where(valid, d2, -big),
                           axis=1, keepdims=True), axis=0, keepdims=True)
    # lane-dense (1,128) stat writes; all lanes carry the same value
    min_ref[0, 0] = jnp.broadcast_to(dmin, (1, 128))
    max_ref[0, 0] = jnp.broadcast_to(dmax, (1, 128))


def _cdist_norm_kernel(stats_ref, a_ref, bt_ref, o_ref):
    cmin = stats_ref[0]          # global min distance (scalar, SMEM)
    inv = stats_ref[1]           # precomputed 1/(max-min), guarded (scalar, SMEM)
    curv = jnp.sqrt(_tile_d2(a_ref[...], bt_ref[...]))
    o_ref[...] = 1.0 - (curv - cmin) * inv


def pallas_cdist_minmax_norm(a, b, *, tile_l=512, tile_s=1024):
    """norm_curv_map = 1 - (cdist(a,b) - min) / (max - min), shape (L, S).

    Tiled for production sizes (L=S~4800 on ScanNet): ~2 MiB f32 output tiles,
    fits v7x's 64 MiB VMEM with double-buffering headroom.  Gram matmul kept
    in f32 (cancellation in small distances; descriptors are scaled by 100).
    """
    L, C = a.shape
    S, _ = b.shape
    TL = min(tile_l, _round_up(L, 8))
    TS = min(tile_s, _round_up(S, 128))
    Lp = _round_up(L, TL)
    Sp = _round_up(S, TS)
    gl, gs = Lp // TL, Sp // TS

    a_p = jnp.zeros((Lp, C), jnp.float32).at[:L].set(a.astype(jnp.float32))
    # pre-transposed second operand -> plain a @ bT, no in-kernel XLU transpose
    bt_p = jnp.zeros((C, Sp), jnp.float32).at[:, :S].set(a.dtype.type(0) + b.astype(jnp.float32).T)

    a_spec = pl.BlockSpec((TL, C), lambda i, j: (i, 0))
    bt_spec = pl.BlockSpec((C, TS), lambda i, j: (0, j))
    stat_spec = pl.BlockSpec((1, 1, 1, 128), lambda i, j: (i, j, 0, 0))

    # ---- pass 1: per-tile min/max of squared distances --------------------
    mins, maxs = pl.pallas_call(
        functools.partial(_cdist_stats_kernel, tl=TL, ts=TS, n_rows=L, n_cols=S),
        out_shape=(jax.ShapeDtypeStruct((gl, gs, 1, 128), jnp.float32),
                   jax.ShapeDtypeStruct((gl, gs, 1, 128), jnp.float32)),
        grid_spec=pltpu.PrefetchScalarGridSpec(
            num_scalar_prefetch=0,
            grid=(gl, gs),
            in_specs=[a_spec, bt_spec],
            out_specs=(stat_spec, stat_spec),
        ),
        compiler_params=pltpu.CompilerParams(
            dimension_semantics=("parallel", "parallel"),
            vmem_limit_bytes=VMEM_LIMIT),
    )(a_p, bt_p)

    cmin = jnp.sqrt(jnp.min(mins))     # sqrt is monotonic: min/max of d == sqrt of min/max d^2
    cmax = jnp.sqrt(jnp.max(maxs))
    rng = cmax - cmin
    # rng==0 guard: constant curv_map -> all-ones (torch would produce NaN/Inf)
    inv = jnp.where(rng > 0.0, 1.0 / rng, jnp.float32(1.0))
    stats = jnp.stack([cmin, inv]).astype(jnp.float32)               # (2,) -> SMEM

    # ---- pass 2: recompute distances per tile and normalize ---------------
    out = pl.pallas_call(
        _cdist_norm_kernel,
        out_shape=jax.ShapeDtypeStruct((Lp, Sp), jnp.float32),
        grid_spec=pltpu.PrefetchScalarGridSpec(
            num_scalar_prefetch=0,
            grid=(gl, gs),
            in_specs=[pl.BlockSpec(memory_space=pltpu.MemorySpace.SMEM),
                      a_spec, bt_spec],
            out_specs=pl.BlockSpec((TL, TS), lambda i, j: (i, j)),
        ),
        compiler_params=pltpu.CompilerParams(
            dimension_semantics=("parallel", "parallel"),
            vmem_limit_bytes=VMEM_LIMIT),
    )(stats, a_p, bt_p)
    return out[:L, :S]


# --------------------------------------------------------------------------
# MiDasDepth.forward
# --------------------------------------------------------------------------
def midas_depth_forward(params, data, scale_factor=100.0, temperature=1.0,
                        sign=False, get_curv_desc=None, get_curv_map=None):
    dataset_name = data["dataset_name"][0]
    img0 = data["img2depth0"]
    img1 = data["img2depth1"]
    sample = jnp.concatenate([img0, img1], axis=0)             # (2, C, Hd, Wd)
    prediction = depth_model_forward(params, sample)           # (2, Hd, Wd)

    if dataset_name == "ScanNet":
        size0 = size1 = (480, 640)
    else:
        size0 = (data["image0"].shape[2], data["image0"].shape[3])
        size1 = (data["image1"].shape[2], data["image1"].shape[3])

    # fused: bicubic resize + *scale_factor + Laplacian curvature map
    if size0 == size1:
        lap = resize_scale_laplacian(prediction, size0[0], size0[1], scale_factor)
        lap0, lap1 = lap[0], lap[1]
    else:
        lap0 = resize_scale_laplacian(prediction[0:1], size0[0], size0[1], scale_factor)[0]
        lap1 = resize_scale_laplacian(prediction[1:2], size1[0], size1[1], scale_factor)[0]

    # default config path: get_curv_desc is None, curv_sign False
    # TODO(synk): cosine-similarity descriptor path and compute_patch_convexity
    # sign path are not exercised (their torch sources are not provided).
    descs0 = patch_descriptors(lap0)                            # (L, C)
    descs1 = patch_descriptors(lap1)                            # (S, C)
    norm_curv_map = pallas_cdist_minmax_norm(descs0, descs1)[None]   # (1, L, S)

    out = dict(data)
    out["curv_map"] = norm_curv_map
    return out


# --------------------------------------------------------------------------
if __name__ == "__main__":
    key = jax.random.PRNGKey(0)
    k_img0, k_img1, k_params = jax.random.split(key, 3)

    # depth-model inputs (img2depth*): small 32x32 RGB crops
    Hd = Wd = 32
    img2depth0 = jax.random.uniform(k_img0, (1, 3, Hd, Wd), jnp.float32)
    img2depth1 = jax.random.uniform(k_img1, (1, 3, Hd, Wd), jnp.float32)
    # original images (only spatial sizes are used for the bicubic resize)
    image0 = jnp.zeros((1, 1, 48, 48), jnp.float32)
    image1 = jnp.zeros((1, 1, 48, 48), jnp.float32)

    params = init_depth_model_params(k_params)

    data = {
        "dataset_name": ["MegaDepth"],
        "img2depth0": img2depth0,
        "img2depth1": img2depth1,
        "image0": image0,
        "image1": image1,
    }

    out = midas_depth_forward(params, data)
    curv = jax.block_until_ready(out["curv_map"])

    L = (48 // PATCH) * (48 // PATCH)
    assert curv.shape == (1, L, L), curv.shape
    assert bool(jnp.all(jnp.isfinite(curv)))
    assert float(jnp.min(curv)) >= -1e-5 and float(jnp.max(curv)) <= 1.0 + 1e-5
    print("KERNEL_OK")
</pallas_src>

<mosaic_0001>
module attributes {stable_mosaic.version = 11 : i64} {
  func.func @_depth_mlp_kernel(%arg0: memref<32x192xbf16, #tpu.memory_space<vmem>>, %arg1: memref<192x64xbf16, #tpu.memory_space<vmem>>, %arg2: memref<1x64xf32, #tpu.memory_space<vmem>>, %arg3: memref<64x128xbf16, #tpu.memory_space<vmem>>, %arg4: memref<1x128xf32, #tpu.memory_space<vmem>>, %arg5: memref<128x64xbf16, #tpu.memory_space<vmem>>, %arg6: memref<1x64xf32, #tpu.memory_space<vmem>>, %arg7: memref<64x128xbf16, #tpu.memory_space<vmem>>, %arg8: memref<1x128xf32, #tpu.memory_space<vmem>>, %arg9: memref<32x128xf32, #tpu.memory_space<vmem>>) attributes {dimension_semantics = [], scalar_prefetch = 0 : i64, scratch_operands = 0 : i64, tpu.core_type = #tpu.core_type<tc>} {
    %c0 = arith.constant 0 : index
    %c0_0 = arith.constant 0 : index
    %0 = vector.load %arg0[%c0, %c0_0] : memref<32x192xbf16, #tpu.memory_space<vmem>>, vector<32x192xbf16>
    %c0_1 = arith.constant 0 : index
    %c0_2 = arith.constant 0 : index
    %1 = vector.load %arg1[%c0_1, %c0_2] : memref<192x64xbf16, #tpu.memory_space<vmem>>, vector<192x64xbf16>
    %cst = arith.constant dense<0.000000e+00> : vector<32x64xf32>
    %2 = tpu.matmul %0, %1, %cst {dimension_numbers = #tpu.dot_dimension_numbers<[1], [0], [0], [1], [0, 0, 1, 1], [], []>} : vector<32x192xbf16>, vector<192x64xbf16>, vector<32x64xf32> -> vector<32x64xf32>
    %c0_3 = arith.constant 0 : index
    %c0_4 = arith.constant 0 : index
    %3 = vector.load %arg2[%c0_3, %c0_4] : memref<1x64xf32, #tpu.memory_space<vmem>>, vector<1x64xf32>
    %4 = vector.broadcast %3 : vector<1x64xf32> to vector<32x64xf32>
    %5 = arith.addf %2, %4 : vector<32x64xf32>
    %6 = arith.mulf %5, %5 : vector<32x64xf32>
    %7 = arith.mulf %5, %6 : vector<32x64xf32>
    %cst_5 = arith.constant 4.471500e-02 : f32
    %8 = vector.broadcast %cst_5 : f32 to vector<32x64xf32>
    %9 = arith.mulf %8, %7 : vector<32x64xf32>
    %10 = arith.addf %5, %9 : vector<32x64xf32>
    %cst_6 = arith.constant 0.797884583 : f32
    %11 = vector.broadcast %cst_6 : f32 to vector<32x64xf32>
    %12 = arith.mulf %11, %10 : vector<32x64xf32>
    %13 = math.tanh %12 : vector<32x64xf32>
    %cst_7 = arith.constant 1.000000e+00 : f32
    %14 = vector.broadcast %cst_7 : f32 to vector<32x64xf32>
    %15 = arith.addf %14, %13 : vector<32x64xf32>
    %cst_8 = arith.constant 5.000000e-01 : f32
    %16 = vector.broadcast %cst_8 : f32 to vector<32x64xf32>
    %17 = arith.mulf %16, %15 : vector<32x64xf32>
    %18 = arith.mulf %5, %17 : vector<32x64xf32>
    %19 = arith.truncf %18 : vector<32x64xf32> to vector<32x64xbf16>
    %c0_9 = arith.constant 0 : index
    %c0_10 = arith.constant 0 : index
    %20 = vector.load %arg3[%c0_9, %c0_10] : memref<64x128xbf16, #tpu.memory_space<vmem>>, vector<64x128xbf16>
    %cst_11 = arith.constant dense<0.000000e+00> : vector<32x128xf32>
    %21 = tpu.matmul %19, %20, %cst_11 {dimension_numbers = #tpu.dot_dimension_numbers<[1], [0], [0], [1], [0, 0, 1, 1], [], []>} : vector<32x64xbf16>, vector<64x128xbf16>, vector<32x128xf32> -> vector<32x128xf32>
    %c0_12 = arith.constant 0 : index
    %c0_13 = arith.constant 0 : index
    %22 = vector.load %arg4[%c0_12, %c0_13] : memref<1x128xf32, #tpu.memory_space<vmem>>, vector<1x128xf32>
    %23 = vector.broadcast %22 : vector<1x128xf32> to vector<32x128xf32>
    %24 = arith.addf %21, %23 : vector<32x128xf32>
    %25 = arith.mulf %24, %24 : vector<32x128xf32>
    %26 = arith.mulf %24, %25 : vector<32x128xf32>
    %cst_14 = arith.constant 4.471500e-02 : f32
    %27 = vector.broadcast %cst_14 : f32 to vector<32x128xf32>
    %28 = arith.mulf %27, %26 : vector<32x128xf32>
    %29 = arith.addf %24, %28 : vector<32x128xf32>
    %cst_15 = arith.constant 0.797884583 : f32
    %30 = vector.broadcast %cst_15 : f32 to vector<32x128xf32>
    %31 = arith.mulf %30, %29 : vector<32x128xf32>
    %32 = math.tanh %31 : vector<32x128xf32>
    %cst_16 = arith.constant 1.000000e+00 : f32
    %33 = vector.broadcast %cst_16 : f32 to vector<32x128xf32>
    %34 = arith.addf %33, %32 : vector<32x128xf32>
    %cst_17 = arith.constant 5.000000e-01 : f32
    %35 = vector.broadcast %cst_17 : f32 to vector<32x128xf32>
    %36 = arith.mulf %35, %34 : vector<32x128xf32>
    %37 = arith.mulf %24, %36 : vector<32x128xf32>
    %38 = arith.truncf %37 : vector<32x128xf32> to vector<32x128xbf16>
    %c0_18 = arith.constant 0 : index
    %c0_19 = arith.constant 0 : index
    %39 = vector.load %arg5[%c0_18, %c0_19] : memref<128x64xbf16, #tpu.memory_space<vmem>>, vector<128x64xbf16>
    %cst_20 = arith.constant dense<0.000000e+00> : vector<32x64xf32>
    %40 = tpu.matmul %38, %39, %cst_20 {dimension_numbers = #tpu.dot_dimension_numbers<[1], [0], [0], [1], [0, 0, 1, 1], [], []>} : vector<32x128xbf16>, vector<128x64xbf16>, vector<32x64xf32> -> vector<32x64xf32>
    %41 = arith.addf %18, %40 : vector<32x64xf32>
    %c0_21 = arith.constant 0 : index
    %c0_22 = arith.constant 0 : index
    %42 = vector.load %arg6[%c0_21, %c0_22] : memref<1x64xf32, #tpu.memory_space<vmem>>, vector<1x64xf32>
    %43 = vector.broadcast %42 : vector<1x64xf32> to vector<32x64xf32>
    %44 = arith.addf %41, %43 : vector<32x64xf32>
    %45 = arith.truncf %44 : vector<32x64xf32> to vector<32x64xbf16>
    %c0_23 = arith.constant 0 : index
    %c0_24 = arith.constant 0 : index
    %46 = vector.load %arg7[%c0_23, %c0_24] : memref<64x128xbf16, #tpu.memory_space<vmem>>, vector<64x128xbf16>
    %cst_25 = arith.constant dense<0.000000e+00> : vector<32x128xf32>
    %47 = tpu.matmul %45, %46, %cst_25 {dimension_numbers = #tpu.dot_dimension_numbers<[1], [0], [0], [1], [0, 0, 1, 1], [], []>} : vector<32x64xbf16>, vector<64x128xbf16>, vector<32x128xf32> -> vector<32x128xf32>
    %c0_26 = arith.constant 0 : index
    %c0_27 = arith.constant 0 : index
    %48 = vector.load %arg8[%c0_26, %c0_27] : memref<1x128xf32, #tpu.memory_space<vmem>>, vector<1x128xf32>
    %49 = vector.broadcast %48 : vector<1x128xf32> to vector<32x128xf32>
    %50 = arith.addf %47, %49 : vector<32x128xf32>
    %cst_28 = arith.constant 0.000000e+00 : f32
    %51 = vector.broadcast %cst_28 : f32 to vector<32x128xf32>
    %52 = arith.maximumf %50, %51 : vector<32x128xf32>
    %c0_29 = arith.constant 0 : index
    %c0_30 = arith.constant 0 : index
    %53 = vector.load %arg9[%c0_29, %c0_30] : memref<32x128xf32, #tpu.memory_space<vmem>>, vector<32x128xf32>
    tpu.vector_store %arg9[%c0_29, %c0_30], %52 {strides = array<i32>} : memref<32x128xf32, #tpu.memory_space<vmem>>, vector<32x128xf32>,
    return
  }
}

</mosaic_0001>

<bundles_post_ra>
// kernel: tpu_custom_call.1
= control target key start
LH: loop header
LB: loop body
LE: loop exit
PB: predicated region body
PF: predicated region fallthrough
CT: control target
= control target key end

     0   :  { %v819_v1 = vmov 0   ;;  %vm159_vm0 = vcmask 523264   ;;  %s1015_s0 = inlined_call_operand.vmem [shape: bf16[32,192], index: 0, kind: input, shape index: {}]   ;;  %s1016_s1 = inlined_call_operand.vmem [shape: bf16[192,64], index: 1, kind: input, shape index: {}]   ;;  %s1017_s2 = inlined_call_operand.vmem [shape: f32[1,64], index: 2, kind: input, shape index: {}]   ;;  %s1018_s3 = inlined_call_operand.vmem [shape: bf16[64,128], index: 3, kind: input, shape index: {}]   ;;  %s1019_s4 = inlined_call_operand.vmem [shape: f32[1,128], index: 4, kind: input, shape index: {}]   ;;  %s1020_s5 = inlined_call_operand.vmem [shape: bf16[128,64], index: 5, kind: input, shape index: {}]   ;;  %s1021_s6 = inlined_call_operand.vmem [shape: f32[1,64], index: 6, kind: input, shape index: {}]   ;;  %s1022_s7 = inlined_call_operand.vmem [shape: bf16[64,128], index: 7, kind: input, shape index: {}]   ;;  %s1023_s8 = inlined_call_operand.vmem [shape: f32[1,128], index: 8, kind: input, shape index: {}]   ;;  %s1024_s9 = inlined_call_operand.hbm [shape: f32[32,128], index: 9, kind: output, shape index: {}]  }
   0x1   :  { %v745_v0 = vld [vmem:[%s1016_s1] sm:$0xff]   ;;  %166 = vmatprep.subr.bf16.mxu0 %v819_v1  ;;  %v746_v2 = vld [vmem:[%s1016_s1 + $0x8] sm:$0xff]   ;;  %v747_v3 = vld [vmem:[%s1016_s1 + $0x10] sm:$0xff]  }
   0x2   :  { %167 = vmatpush1.bf16.msra.mxu0 %v745_v0  ;;  %v748_v4 = vld [vmem:[%s1016_s1 + $0x18] sm:$0xff]   ;;  %v759_v5 = vld [vmem:[%s1015_s0 + $0x4] ss:$8 sps:$4 sm:$0xff]   ;;  %v751_v8 = vld [vmem:[%s1016_s1 + $0x30] sm:$0xff]  }
   0x3   :  { %168 = vmatprep.subr.bf16.mxu0 %v819_v1  ;;  %v749_v6 = vld [vmem:[%s1016_s1 + $0x20] sm:$0xff]   ;;  %650 = vmatprep.mubr.msk.bf16.mxu0 %vm159_vm0, %v759_v5  ;;  %v750_v7 = vld [vmem:[%s1016_s1 + $0x28] sm:$0xff]  }
   0x6   :  { %169 = vmatpush1.bf16.msra.mxu0 %v746_v2 }
   0x7   :  { %170 = vmatprep.subr.bf16.mxu0 %v819_v1 }
   0xa   :  { %171 = vmatpush1.bf16.msra.mxu0 %v747_v3 }
   0xb   :  { %172 = vmatprep.subr.bf16.mxu0 %v819_v1 }
   0xe   :  { %173 = vmatpush1.bf16.msra.mxu0 %v748_v4 }
   0xf   :  { %174 = vmatprep.subr.bf16.mxu0 %v819_v1 }
  0x12   :  { %175 = vmatpush1.bf16.msra.mxu0 %v749_v6 }
  0x13   :  { %176 = vmatprep.subr.bf16.mxu0 %v819_v1 }
  0x16   :  { %177 = vmatpush1.bf16.msra.mxu0 %v750_v7 }
  0x17   :  { %178 = vmatprep.subr.bf16.mxu0 %v819_v1 }
  0x18   :  { %14 = vsyncpa [#allocation3], 0  ;;  %v752_v9 = vld [vmem:[%s1016_s1 + $0x38] sm:$0xff]   ;;  %v753_v10 = vld [vmem:[%s1016_s1 + $0x40] sm:$0xff]  }
  0x19   :  { %v754_v11 = vld [vmem:[%s1016_s1 + $0x48] sm:$0xff]   ;;  %v755_v12 = vld [vmem:[%s1016_s1 + $0x50] sm:$0xff]   ;;  %v756_v13 = vld [vmem:[%s1016_s1 + $0x58] sm:$0xff]  }
  0x1a   :  { %179 = vmatpush1.bf16.msra.mxu0 %v751_v8  ;;  %v757_v14 = vld [vmem:[%s1015_s0] ss:$8 sps:$4 sm:$0xff]   ;;  %v760_v15 = vld [vmem:[%s1015_s0 + $0x14] ss:$8 sps:$4 sm:$0xff]   ;;  %v762_v16 = vld [vmem:[%s1015_s0 + $0x10] ss:$8 sps:$4 sm:$0xff]  }
  0x1b   :  { %180 = vmatprep.subr.bf16.mxu0 %v819_v1  ;;  %v763_v17 = vld [vmem:[%s1018_s3] sm:$0xff]   ;;  %v764_v18 = vld [vmem:[%s1018_s3 + $0x8] sm:$0xff]   ;;  %v765_v19 = vld [vmem:[%s1018_s3 + $0x10] sm:$0xff]  }
  0x1c   :  { %697 = vmatprep.subr.bf16.mxu1 %v763_v17  ;;  %v766_v20 = vld [vmem:[%s1018_s3 + $0x18] sm:$0xff]   ;;  %v633_v21 = vld [vmem:[%s1017_s2] ss:$0 sm:$0xff]  ;;  %s820_s3 = smov [#allocation2]  }
  0x1d   :  { %698 = vmatpush3.bf16.msra.mxu1 %v763_v17  ;;  %v767_v8 = vld [vmem:[%s1020_s5] sm:$0xff]   ;;  %v776_v17 = vld [vmem:[%s1022_s7 + $0x8] sm:$0xff]   ;;  %s622_s28 = sshll.u32 %s820_s3, 4  ;;  %s623_s28 = int_to_ptr.vmem [resolvable:$true] %s622_s28 }
  0x1e   :  { %181 = vmatpush1.bf16.msra.mxu0 %v752_v9  ;;  %699 = vmatprep.subr.bf16.mxu1 %v764_v18  ;;  %v768_v9 = vld [vmem:[%s1020_s5 + $0x8] sm:$0xff]   ;;  %p800_p1 = scmp.lt.s32.totalorder %s623_s28, %s623_s28 }
  0x1f   :  { %182 = vmatprep.subr.bf16.mxu0 %v819_v1 }
  0x21   :  { %700 = vmatpush3.bf16.msra.mxu1 %v764_v18  ;;  %v652_v18 = vld [vmem:[%s1019_s4] ss:$0 sm:$0xff] }
  0x22   :  { %183 = vmatpush1.bf16.msra.mxu0 %v753_v10  ;;  %701 = vmatprep.subr.bf16.mxu1 %v765_v19  ;;  %v769_v10 = vld [vmem:[%s1020_s5 + $0x10] sm:$0xff]  }
  0x23   :  { %184 = vmatprep.subr.bf16.mxu0 %v819_v1 }
  0x25   :  { %702 = vmatpush3.bf16.msra.mxu1 %v765_v19 }
  0x26   :  { %185 = vmatpush1.bf16.msra.mxu0 %v754_v11  ;;  %703 = vmatprep.subr.bf16.mxu1 %v766_v20  ;;  %v770_v11 = vld [vmem:[%s1020_s5 + $0x18] sm:$0xff]  }
  0x27   :  { %186 = vmatprep.subr.bf16.mxu0 %v819_v1 }
  0x29   :  { %704 = vmatpush3.bf16.msra.mxu1 %v766_v20 }
  0x2a   :  { %187 = vmatpush1.bf16.msra.mxu0 %v755_v12  ;;  %709 = vmatprep.subr.bf16.mxu1 %v767_v8  ;;  %v771_v12 = vld [vmem:[%s1020_s5 + $0x20] sm:$0xff]  }
  0x2b   :  { %188 = vmatprep.subr.bf16.mxu0 %v819_v1 }
  0x2e   :  { %189 = vmatpush1.bf16.msra.mxu0 %v756_v13  ;;  %v772_v13 = vld [vmem:[%s1020_s5 + $0x28] sm:$0xff]  }
  0x31   :  { %199 = vmatmul.mubr.bf16.vlgmr.msra.gmra.mrb[0].mxu0 %v757_v14  ;;  %v773_v14 = vld [vmem:[%s1020_s5 + $0x30] sm:$0xff]  }
  0x32   :  { %651 = vmatprep.mubr.msk.bf16.mxu0 %vm159_vm0, %v760_v15  ;;  %v774_v15 = vld [vmem:[%s1020_s5 + $0x38] sm:$0xff]  }
  0x39   :  { %207 = vmatmul.mubr.bf16.gmra.mrb[4].mxu0 %v762_v16  ;;  %v775_v16 = vld [vmem:[%s1022_s7] sm:$0xff]  }
  0x3a   :  { %729 = vmatprep.subr.bf16.mxu0 %v775_v16 }
  0x3b   :  { %730 = vmatpush3.bf16.msra.mxu0 %v775_v16 }
  0x3c   :  { %731 = vmatprep.subr.bf16.mxu0 %v776_v17 }
  0x3f   :  { %732 = vmatpush3.bf16.msra.mxu0 %v776_v17 }
 0x104   :  { %v200_v22 = vpop.f32.mrb[0].mxu0 }
 0x105   :  { %v201_v23 = vadd.f32 %v633_v21, %v200_v22  ;;  %v202_v24 = vpop.f32.mrb[1].mxu0 }
 0x106   :  { %v203_v25 = vpop.f32.mrb[2].mxu0 }
 0x107   :  { %v215_v26 = vmul.f32 %v201_v23, %v201_v23  ;;  %v204_v27 = vadd.f32 %v633_v21, %v203_v25  ;;  %v205_v28 = vpop.f32.mrb[3].mxu0 }
 0x109   :  { %v219_v29 = vmul.f32 %v215_v26, %v201_v23  ;;  %v216_v30 = vmul.f32 %v204_v27, %v204_v27 }
 0x10b   :  { %v223_v31 = vmul.f32 0.044715, %v219_v29  ;;  %v220_v32 = vmul.f32 %v216_v30, %v204_v27 }
 0x10c   :  { %v208_v33 = vpop.f32.mrb[4].mxu0 }
 0x10d   :  { %v227_v34 = vadd.f32 %v223_v31, %v201_v23  ;;  %v224_v35 = vmul.f32 0.044715, %v220_v32  ;;  %v209_v36 = vadd.f32 %v633_v21, %v208_v33  ;;  %v210_v37 = vpop.f32.mrb[5].mxu0 }
 0x10e   :  { %v211_v38 = vpop.f32.mrb[6].mxu0 }
 0x10f   :  { %v231_v39 = vmul.f32 0.7978846, %v227_v34  ;;  %v228_v40 = vadd.f32 %v224_v35, %v204_v27  ;;  %v217_v41 = vmul.f32 %v209_v36, %v209_v36  ;;  %v212_v42 = vadd.f32 %v633_v21, %v211_v38  ;;  %v213_v43 = vpop.f32.mrb[7].mxu0 }
 0x111   :  { %v232_v44 = vmul.f32 0.7978846, %v228_v40  ;;  %v221_v45 = vmul.f32 %v217_v41, %v209_v36  ;;  %v218_v46 = vmul.f32 %v212_v42, %v212_v42  ;;  %779 = vtanh.f32 %v231_v39 }
 0x113   :  { %v225_v47 = vmul.f32 0.044715, %v221_v45  ;;  %v222_v48 = vmul.f32 %v218_v46, %v212_v42  ;;  %781 = vtanh.f32 %v232_v44 }
 0x115   :  { %v229_v49 = vadd.f32 %v225_v47, %v209_v36  ;;  %v226_v50 = vmul.f32 0.044715, %v222_v48 }
 0x117   :  { %v233_v51 = vmul.f32 0.7978846, %v229_v49  ;;  %v230_v52 = vadd.f32 %v226_v50, %v212_v42 }
 0x119   :  { %783 = vtanh.f32 %v233_v51  ;;  %v234_v53 = vmul.f32 0.7978846, %v230_v52 }
 0x11b   :  { %v780_v54 = vpop.eup %779  ;;  %785 = vtanh.f32 %v234_v53 }
 0x11c   :  { %v239_v55 = vadd.f32 1.0, %v780_v54 }
 0x11d   :  { %v782_v56 = vpop.eup %781 }
 0x11e   :  { %v240_v57 = vadd.f32 1.0, %v782_v56  ;;  %v243_v58 = vmul.f32 0.5, %v239_v55 }
 0x120   :  { %v244_v59 = vmul.f32 0.5, %v240_v57  ;;  %v938_v60 = vmul.f32 %v243_v58, %v201_v23 }
 0x122   :  { %v940_v61 = vmul.f32 %v244_v59, %v204_v27 }
 0x123   :  { %v784_v62 = vpop.eup %783 }
 0x124   :  { %v241_v63 = vadd.f32 1.0, %v784_v62  ;;  %v251_v0 = vpack.c.bf16 %v940_v61, %v938_v60 }
 0x125   :  { %v786_v1 = vpop.eup %785 }
 0x126   :  { %v245_v2 = vmul.f32 0.5, %v241_v63  ;;  %v242_v3 = vadd.f32 1.0, %v786_v1  ;;  %705 = vmatprep.mubr.msk.bf16.mxu1 %vm159_vm0, %v251_v0 }
 0x128   :  { %v246_v4 = vmul.f32 0.5, %v242_v3  ;;  %v945_v5 = vmul.f32 %v245_v2, %v209_v36  ;;  %v777_v3 = vld [vmem:[%s1022_s7 + $0x10] sm:$0xff]  }
 0x129   :  { %733 = vmatprep.subr.bf16.mxu0 %v777_v3 }
 0x12a   :  { %v947_v6 = vmul.f32 %v246_v4, %v212_v42  ;;  %734 = vmatpush3.bf16.msra.mxu0 %v777_v3  ;;  %v778_v4 = vld [vmem:[%s1022_s7 + $0x18] sm:$0xff]  }
 0x12b   :  { %735 = vmatprep.subr.bf16.mxu0 %v778_v4 }
 0x12c   :  { %v252_v7 = vpack.c.bf16 %v947_v6, %v945_v5 }
 0x12e   :  { %706 = vmatmul.mubr.msk.bf16.vlgmr.msra.gmra.mrb[0].mxu1 %vm159_vm0, %v252_v7  ;;  %736 = vmatpush3.bf16.msra.mxu0 %v778_v4 }
 0x12f   :  { %710 = vmatpush3.bf16.msra.mxu1 %v767_v8 }
 0x130   :  { %711 = vmatprep.subr.bf16.mxu1 %v768_v9 }
 0x133   :  { %712 = vmatpush3.bf16.msra.mxu1 %v768_v9 }
 0x134   :  { %713 = vmatprep.subr.bf16.mxu1 %v769_v10 }
 0x137   :  { %714 = vmatpush3.bf16.msra.mxu1 %v769_v10  ;;  %v667_v10 = vld [vmem:[%s1021_s6] ss:$0 sm:$0xff] }
 0x138   :  { %715 = vmatprep.subr.bf16.mxu1 %v770_v11 }
 0x13b   :  { %716 = vmatpush3.bf16.msra.mxu1 %v770_v11 }
 0x13c   :  { %717 = vmatprep.subr.bf16.mxu1 %v771_v12 }
 0x13f   :  { %718 = vmatpush3.bf16.msra.mxu1 %v771_v12 }
 0x140   :  { %719 = vmatprep.subr.bf16.mxu1 %v772_v13 }
 0x143   :  { %720 = vmatpush3.bf16.msra.mxu1 %v772_v13 }
 0x144   :  { %721 = vmatprep.subr.bf16.mxu1 %v773_v14 }
 0x147   :  { %722 = vmatpush3.bf16.msra.mxu1 %v773_v14 }
 0x148   :  { %723 = vmatprep.subr.bf16.mxu1 %v774_v15 }
 0x14b   :  { %724 = vmatpush3.bf16.msra.mxu1 %v774_v15 }
 0x201   :  { %v707_v19 = vpop.f32.mrb[0].mxu1 }
 0x202   :  { %v341_v20 = vadd.f32 %v707_v19, %v652_v18  ;;  %v332_v21 = vpop.f32.mrb[1].mxu1 }
 0x203   :  { %v333_v22 = vadd.f32 %v652_v18, %v332_v21  ;;  %v708_v23 = vpop.f32.mrb[2].mxu1 }
 0x204   :  { %v349_v24 = vmul.f32 %v341_v20, %v341_v20  ;;  %v344_v25 = vadd.f32 %v708_v23, %v652_v18  ;;  %v335_v26 = vpop.f32.mrb[3].mxu1 }
 0x205   :  { %v347_v27 = vmul.f32 %v333_v22, %v333_v22  ;;  %v336_v28 = vadd.f32 %v652_v18, %v335_v26 }
 0x206   :  { %v353_v29 = vmul.f32 %v349_v24, %v341_v20  ;;  %v350_v30 = vmul.f32 %v344_v25, %v344_v25 }
 0x207   :  { %v351_v31 = vmul.f32 %v347_v27, %v333_v22  ;;  %v348_v32 = vmul.f32 %v336_v28, %v336_v28 }
 0x208   :  { %v357_v33 = vmul.f32 0.044715, %v353_v29  ;;  %v354_v34 = vmul.f32 %v350_v30, %v344_v25 }
 0x209   :  { %v355_v35 = vmul.f32 0.044715, %v351_v31  ;;  %v352_v36 = vmul.f32 %v348_v32, %v336_v28 }
 0x20a   :  { %v361_v37 = vadd.f32 %v357_v33, %v341_v20  ;;  %v358_v38 = vmul.f32 0.044715, %v354_v34 }
 0x20b   :  { %v359_v39 = vadd.f32 %v355_v35, %v333_v22  ;;  %v356_v40 = vmul.f32 0.044715, %v352_v36 }
 0x20c   :  { %v365_v41 = vmul.f32 0.7978846, %v361_v37  ;;  %v362_v42 = vadd.f32 %v358_v38, %v344_v25 }
 0x20d   :  { %v363_v43 = vmul.f32 0.7978846, %v359_v39  ;;  %v360_v44 = vadd.f32 %v356_v40, %v336_v28 }
 0x20e   :  { %787 = vtanh.f32 %v365_v41  ;;  %v366_v45 = vmul.f32 0.7978846, %v362_v42 }
 0x20f   :  { %789 = vtanh.f32 %v363_v43  ;;  %v364_v46 = vmul.f32 0.7978846, %v360_v44 }
 0x210   :  { %791 = vtanh.f32 %v366_v45 }
 0x211   :  { %793 = vtanh.f32 %v364_v46 }
 0x218   :  { %v788_v47 = vpop.eup %787 }
 0x219   :  { %v790_v48 = vpop.eup %789  ;;  %v373_v49 = vadd.f32 1.0, %v788_v47 }
 0x21a   :  { %v792_v50 = vpop.eup %791  ;;  %v371_v51 = vadd.f32 1.0, %v790_v48 }
 0x21b   :  { %v794_v52 = vpop.eup %793  ;;  %v377_v53 = vmul.f32 0.5, %v373_v49  ;;  %v374_v54 = vadd.f32 1.0, %v792_v50 }
 0x21c   :  { %v372_v55 = vadd.f32 1.0, %v794_v52  ;;  %v375_v56 = vmul.f32 0.5, %v371_v51 }
 0x21d   :  { %v378_v57 = vmul.f32 0.5, %v374_v54  ;;  %v381_v59 = vmul.f32 %v377_v53, %v341_v20 }
 0x21e   :  { %v376_v58 = vmul.f32 0.5, %v372_v55  ;;  %v379_v63 = vmul.f32 %v375_v56, %v333_v22 }
 0x21f   :  { %v382_v62 = vmul.f32 %v378_v57, %v344_v25 }
 0x220   :  { %v380_v0 = vmul.f32 %v376_v58, %v336_v28 }
 0x221   :  { %v384_v1 = vpack.c.bf16 %v382_v62, %v381_v59 }
 0x222   :  { %v383_v2 = vpack.c.bf16 %v380_v0, %v379_v63 }
 0x224   :  { %725 = vmatprep.mubr.bf16.mxu1 %v383_v2 }
 0x225   :  { %726 = vmatmul.mubr.bf16.vlgmr.msra.gmra.mrb[4].mxu1 %v384_v1 }
 0x2f8   :  { %v727_v7 = vpop.f32.mrb[4].mxu1 }
 0x2f9   :  { %v500_v8 = vadd.f32 %v727_v7, %v945_v5  ;;  %v483_v9 = vpop.f32.mrb[5].mxu1 }
 0x2fa   :  { %v498_v11 = vadd.f32 %v483_v9, %v938_v60  ;;  %v728_v12 = vpop.f32.mrb[6].mxu1  ;;  %v668_v60 = vld [vmem:[%s1023_s8] ss:$0 sm:$0xff]  ;;  %s795_s8 = scalar_lea.vmem %s623_s28, 512 }
 0x2fb   :  { %v501_v13 = vadd.f32 %v728_v12, %v947_v6  ;;  %v486_v14 = vpop.f32.mrb[7].mxu1  ;;  %v511_v16 = vadd.f32 %v667_v10, %v500_v8  ;;  %p796_p0 = scmp.ne.s32.totalorder %s623_s28, %s795_s8  ;;  %p801_p2 = scmp.lt.s32.totalorder %s795_s8, %s795_s8 }
 0x2fc   :  { %v499_v15 = vadd.f32 %v486_v14, %v940_v61  ;;  %v509_v18 = vadd.f32 %v667_v10, %v498_v11 }
 0x2fd   :  { %v512_v17 = vadd.f32 %v667_v10, %v501_v13  ;;  %p802_p3 = por %p801_p2, %p800_p1 }
 0x2fe   :  { %v510_v19 = vadd.f32 %v667_v10, %v499_v15 }
 0x2ff   :  { %v514_v20 = vpack.c.bf16 %v512_v17, %v511_v16  ;;  %p803_p4 = pnand %p802_p3, %p796_p0 }
 0x300   :  { %v513_v21 = vpack.c.bf16 %v510_v19, %v509_v18 }
 0x302   :  { %737 = vmatprep.mubr.msk.bf16.mxu0 %vm159_vm0, %v513_v21 }
 0x303   :  { %738 = vmatmul.mubr.msk.bf16.vlgmr.msra.gmra.mrb[8].mxu0 %vm159_vm0, %v514_v20 }
 0x3d6   :  { %v739_v5 = vpop.f32.mrb[8].mxu0 }
 0x3d7   :  { %v603_v22 = vadd.f32 %v739_v5, %v668_v60  ;;  %v594_v6 = vpop.f32.mrb[9].mxu0 }
 0x3d8   :  { %v595_v23 = vadd.f32 %v668_v60, %v594_v6  ;;  %v740_v24 = vpop.f32.mrb[10].mxu0 }
 0x3d9   :  { %v611_v61 = vmax.f32 %v603_v22, 0.0  ;;  %v606_v25 = vadd.f32 %v740_v24, %v668_v60  ;;  %v597_v26 = vpop.f32.mrb[11].mxu0 }
 0x3da   :  { %v609_v27 = vmax.f32 %v595_v23, 0.0  ;;  %v598_v28 = vadd.f32 %v668_v60, %v597_v26 }
 0x3db   :  { %615 = vst [vmem:[#allocation2 + $0x10] sm:$0xff] %v611_v61  ;;  %v612_v29 = vmax.f32 %v606_v25, 0.0 }
 0x3dc   :  { %613 = vst [vmem:[#allocation2] sm:$0xff] %v609_v27  ;;  %v610_v30 = vmax.f32 %v598_v28, 0.0 }
 0x3dd   :  { %616 = vst [vmem:[#allocation2 + $0x18] sm:$0xff] %v612_v29 }
 0x3de   :  { %614 = vst [vmem:[#allocation2 + $0x8] sm:$0xff] %v610_v30 }
 0x3df   :  { %806 = shalt.err (!%p803_p4)
}
 0x3e0   :  { %s807_s10 = scalar_lea.hbm %s1024_s9, 512 }
 0x3e1   :  { %p808_p5 = scmp.ne.s32.totalorder %s1024_s9, %s807_s10  ;;  %p811_p6 = scmp.lt.u32.totalorder %s807_s10, %s1024_s9 }
 0x3e3   :  { %p813_p7 = pnand %p811_p6, %p808_p5 }
 0x3e5   :  { %816 = shalt.err (!%p813_p7)
}
 0x3e6   :  { %s821_s15 = smov 128   ;;  %s822_s16 = smov 8  }
 0x3e7   :  { %628 = dma.vmem_to_hbm [thread:$0]  %s623_s28, 512, %s1024_s9, [#allocation3], %s821_s15, %s821_s15, %s822_s16  }
 0x3e8   :  { %817 = dma.done.wait [#allocation3], 512  }
 0x3e9   :  { %818 = vsyncadd [#allocation3], 4294966784 }
 0x3ea   :  { %632 = vsyncpa [#allocation3], 1 }

</bundles_post_ra>
